<compile_context>
chip_gen: v7x
topology: tpu7x:2x2x1
jax: 0.10.0
libtpu: 0.0.40
codegen_flags: <defaults>
</compile_context>

<pallas_src>
import functools

import jax
import jax.numpy as jnp
from jax.experimental import pallas as pl
from jax.experimental.pallas import tpu as pltpu

LANE = 128  # TPU lane width; class-block size for the gather path


def _round_up(x, m):
    return (x + m - 1) // m * m


def _cdiv(a, b):
    return (a + b - 1) // b


# -----------------------------------------------------------------------------
# Streaming kernel: full (TB, C) logits block per step (small / moderate C).
# -----------------------------------------------------------------------------
def _stream_kernel(logits_ref, label_ref, out_ref, *, tb, c):
    blk = logits_ref[...]                                     # (TB, C) native dtype
    lbl = label_ref[...]                                      # (TB, 1) int32 (-1 = padded row)
    col = jax.lax.broadcasted_iota(jnp.int32, (tb, c), 1)     # class ids per lane
    sel = jnp.where(col == lbl, blk, jnp.zeros_like(blk))     # <=1 nonzero per row
    # Lane reduce in the native dtype is exact (single nonzero per row);
    # upcast only the selected per-row values before the f32 accumulation.
    row_vals = jnp.sum(sel, axis=1, keepdims=True).astype(jnp.float32)  # (TB, 1)
    tile_sum = jnp.sum(row_vals)                                         # f32 scalar
    lane_ids = jax.lax.broadcasted_iota(jnp.int32, (1, 1, LANE), 2)
    out_ref[...] = jnp.where(lane_ids == 0, tile_sum, 0.0)    # lane-dense 128-wide store


# -----------------------------------------------------------------------------
# Gather kernel: manual per-row 128-lane-block DMAs, double-buffered (large C).
# -----------------------------------------------------------------------------
def _gather_kernel(col0_ref, logits_ref, lane_ref, out_ref, buf, sem, *, tb, nrows):
    t = pl.program_id(0)
    nt = pl.num_programs(0)
    slot = t % 2

    def issue(tile, slot_):
        # Issue TB single-row DMAs (each row's 128-lane class block) into buf[slot_].
        def body(r, carry):
            idx = tile * tb + r
            row = jnp.minimum(idx, nrows - 1)       # padded rows re-read a valid row
            c0 = col0_ref[idx]                      # per-row class-block start (SMEM)
            pltpu.make_async_copy(
                logits_ref.at[row, pl.ds(c0, LANE)],
                buf.at[slot_, r],
                sem.at[slot_],
            ).start()
            return carry
        jax.lax.fori_loop(0, tb, body, 0)

    def wait_all(slot_):
        # All TB copies of a slot share one DMA semaphore; wait with a
        # same-sized descriptor TB times (only the byte count matters).
        def body(r, carry):
            pltpu.make_async_copy(
                logits_ref.at[0, pl.ds(0, LANE)],
                buf.at[slot_, 0],
                sem.at[slot_],
            ).wait()
            return carry
        jax.lax.fori_loop(0, tb, body, 0)

    @pl.when(t == 0)
    def _():
        issue(0, 0)                                 # prime slot 0

    @pl.when(t + 1 < nt)
    def _():
        issue(t + 1, 1 - slot)                      # prefetch next tile into other slot

    wait_all(slot)

    blk = buf[slot].astype(jnp.float32)             # (TB, 128)
    lane_ids = jax.lax.broadcasted_iota(jnp.int32, (tb, LANE), 1)
    sel = jnp.where(lane_ids == lane_ref[...], blk, 0.0)       # lane_ref: (TB,1), -1 = padded
    partial = jnp.sum(sel, axis=0, keepdims=True)               # (1, 128) lane-dense
    out_ref[...] = partial.reshape(1, 1, LANE)


# -----------------------------------------------------------------------------
# Wrappers
# -----------------------------------------------------------------------------
def _logit_loss_stream(logits, label_i32, tb):
    B, C = logits.shape
    nt = _cdiv(B, tb)
    b_pad = nt * tb
    pad = b_pad - B
    if pad:
        logits = jnp.pad(logits, ((0, pad), (0, 0)))
        label_i32 = jnp.concatenate([label_i32, jnp.full((pad,), -1, jnp.int32)])
    label_col = label_i32.reshape(b_pad, 1)

    return pl.pallas_call(
        functools.partial(_stream_kernel, tb=tb, c=C),
        out_shape=jax.ShapeDtypeStruct((nt, 1, LANE), jnp.float32),
        grid=(nt,),
        in_specs=[
            pl.BlockSpec((tb, C), lambda t: (t, 0)),
            pl.BlockSpec((tb, 1), lambda t: (t, 0)),
        ],
        out_specs=pl.BlockSpec((1, 1, LANE), lambda t: (t, 0, 0)),
        compiler_params=pltpu.CompilerParams(
            dimension_semantics=("parallel",),        # independent tiles (megacore on v7x)
            vmem_limit_bytes=32 * 1024 * 1024,
        ),
    )(logits, label_col)


def _logit_loss_gather(logits, label_i32, tb):
    B, C = logits.shape
    nt = _cdiv(B, tb)
    b_pad = nt * tb

    # Precompute per-row class-block start and lane in the wrapper (free XLA work).
    lbl = jnp.clip(label_i32, 0, C - 1)
    col0 = jnp.clip((lbl // LANE) * LANE, 0, C - LANE).astype(jnp.int32)
    lane = (lbl - col0).astype(jnp.int32)

    pad = b_pad - B
    if pad:
        col0 = jnp.concatenate([col0, jnp.zeros((pad,), jnp.int32)])
        lane = jnp.concatenate([lane, jnp.full((pad,), -1, jnp.int32)])  # never matches
    lane_col = lane.reshape(b_pad, 1)

    # Note: col0 (b_pad int32) lives in SMEM via scalar prefetch; for extremely
    # large B chunk the call in the wrapper to stay under SMEM limits.
    grid_spec = pltpu.PrefetchScalarGridSpec(
        num_scalar_prefetch=1,
        grid=(nt,),
        in_specs=[
            pl.BlockSpec(memory_space=pl.ANY),                   # logits stay in HBM
            pl.BlockSpec((tb, 1), lambda t, c0: (t, 0)),         # per-row target lanes
        ],
        out_specs=pl.BlockSpec((1, 1, LANE), lambda t, c0: (t, 0, 0)),
        scratch_shapes=[
            pltpu.VMEM((2, tb, LANE), logits.dtype),             # double-buffered gather
            pltpu.SemaphoreType.DMA((2,)),
        ],
    )

    return pl.pallas_call(
        functools.partial(_gather_kernel, tb=tb, nrows=B),
        out_shape=jax.ShapeDtypeStruct((nt, 1, LANE), jnp.float32),
        grid_spec=grid_spec,
        compiler_params=pltpu.CompilerParams(
            dimension_semantics=("arbitrary",),      # manual cross-step double buffer
        ),
    )(col0, logits, lane_col)


def logit_loss(logits, label, *, mode="auto", batch_tile=None, stream_max_classes=4096):
    """logits: (B, C) float, label: (B,) int -> scalar loss (dtype of logits)."""
    B, C = logits.shape
    label_i32 = label.astype(jnp.int32).reshape(B)

    if mode == "auto":
        mode = "stream" if C <= stream_max_classes else "gather"
    if mode == "gather" and C < LANE:
        mode = "stream"  # gather needs at least one full 128-lane class block

    if mode == "stream":
        if batch_tile is None:
            budget = 4 * 1024 * 1024  # per-buffer VMEM budget (fits all generations)
            tb = (budget // max(1, C * logits.dtype.itemsize)) // 8 * 8
            tb = max(8, min(512, tb))
            tb = min(tb, _round_up(B, 8))
        else:
            tb = max(8, _round_up(batch_tile, 8))
        partials = _logit_loss_stream(logits, label_i32, tb)
    elif mode == "gather":
        if batch_tile is None:
            tb = min(128, _round_up(B, 8))
        else:
            tb = max(8, _round_up(batch_tile, 8))
        partials = _logit_loss_gather(logits, label_i32, tb)
    else:
        raise ValueError(f"unknown mode: {mode}")

    # Small wrapper-side reduce of the lane-dense per-tile partials (f32), then
    # match torch's output dtype (same as logits).
    return jnp.sum(partials, dtype=jnp.float32).astype(logits.dtype)


if __name__ == "__main__":
    key = jax.random.PRNGKey(0)

    configs = [
        # (B,  C,   dtype,         mode,     batch_tile)
        (8,   128, jnp.float32,  "auto",   None),  # tiny, lane-aligned, streaming
        (40,  200, jnp.float32,  "stream", 16),    # non-aligned C, multi-tile streaming
        (40,  384, jnp.float32,  "gather", 16),    # manual-DMA gather path, 3 tiles
        (24,  512, jnp.bfloat16, "stream", 8),     # bf16 logits through streaming path
    ]

    for (B, C, dtype, mode, bt) in configs:
        key, k1, k2 = jax.random.split(key, 3)
        logits = jax.random.normal(k1, (B, C), dtype=jnp.float32).astype(dtype)
        label = jax.random.randint(k2, (B,), 0, C, dtype=jnp.int32)

        loss = jax.block_until_ready(logit_loss(logits, label, mode=mode, batch_tile=bt))

        ref = jnp.sum(
            jnp.take_along_axis(logits.astype(jnp.float32), label[:, None], axis=1)
        )
        if dtype == jnp.float32:
            ok = jnp.allclose(loss, ref, rtol=1e-5, atol=1e-4)
        else:  # final downcast to bf16 loses precision; compare loosely
            ok = jnp.allclose(jnp.float32(loss), ref, rtol=5e-2, atol=1e-1)
        assert ok, (B, C, mode, float(jnp.float32(loss)), float(ref))

    print("KERNEL_OK")
</pallas_src>

<mosaic_0001>
module attributes {stable_mosaic.version = 11 : i64} {
  func.func @_stream_kernel(%arg0: i32, %arg1: memref<8x128xf32, #tpu.memory_space<vmem>>, %arg2: memref<8x1xi32, #tpu.memory_space<vmem>>, %arg3: memref<1x1x128xf32, #tpu.memory_space<vmem>>) attributes {dimension_semantics = [#tpu.dimension_semantics<parallel>], iteration_bounds = array<i64: 1>, scalar_prefetch = 0 : i64, scratch_operands = 0 : i64, tpu.core_type = #tpu.core_type<tc>, window_params = [{transform_indices = @transform_0, window_bounds = array<i64: 8, 128>}, {transform_indices = @transform_1, window_bounds = array<i64: 8, 1>}, {transform_indices = @transform_2, window_bounds = array<i64: 1, 1, 128>}]} {
    %c0 = arith.constant 0 : index
    %c0_0 = arith.constant 0 : index
    %0 = vector.load %arg1[%c0, %c0_0] : memref<8x128xf32, #tpu.memory_space<vmem>>, vector<8x128xf32>
    %c0_1 = arith.constant 0 : index
    %c0_2 = arith.constant 0 : index
    %1 = vector.load %arg2[%c0_1, %c0_2] : memref<8x1xi32, #tpu.memory_space<vmem>>, vector<8x1xi32>
    %2 = tpu.iota {dimensions = array<i32: 1>} : vector<8x128xi32>
    %3 = vector.broadcast %1 : vector<8x1xi32> to vector<8x128xi32>
    %4 = arith.cmpi eq, %2, %3 : vector<8x128xi32>
    %cst = arith.constant 0.000000e+00 : f32
    %5 = vector.broadcast %cst : f32 to vector<8x128xf32>
    %6 = arith.select %4, %0, %5 : vector<8x128xi1>, vector<8x128xf32>
    %cst_3 = arith.constant dense<0.000000e+00> : vector<8xf32>
    %7 = vector.multi_reduction <add>, %6, %cst_3 [1] : vector<8x128xf32> to vector<8xf32>
    %8 = vector.shape_cast %7 : vector<8xf32> to vector<8x1xf32>
    %9 = vector.shape_cast %8 : vector<8x1xf32> to vector<1x8x1xf32>
    %cst_4 = arith.constant dense<0.000000e+00> : vector<1xf32>
    %10 = vector.multi_reduction <add>, %9, %cst_4 [1, 2] : vector<1x8x1xf32> to vector<1xf32>
    %11 = vector.shape_cast %10 : vector<1xf32> to vector<1x1x1xf32>
    %12 = vector.extract %11[0, 0, 0] : f32 from vector<1x1x1xf32>
    %13 = tpu.iota {dimensions = array<i32: 2>} : vector<1x1x128xi32>
    %c0_i32 = arith.constant 0 : i32
    %14 = vector.broadcast %c0_i32 : i32 to vector<1x1x128xi32>
    %15 = arith.cmpi eq, %13, %14 : vector<1x1x128xi32>
    %cst_5 = arith.constant 0.000000e+00 : f32
    %16 = vector.broadcast %12 : f32 to vector<1x1x128xf32>
    %17 = vector.broadcast %cst_5 : f32 to vector<1x1x128xf32>
    %18 = arith.select %15, %16, %17 : vector<1x1x128xi1>, vector<1x1x128xf32>
    %c0_6 = arith.constant 0 : index
    %c0_7 = arith.constant 0 : index
    %c0_8 = arith.constant 0 : index
    %19 = vector.load %arg3[%c0_6, %c0_7, %c0_8] : memref<1x1x128xf32, #tpu.memory_space<vmem>>, vector<1x1x128xf32>
    tpu.vector_store %arg3[%c0_6, %c0_7, %c0_8], %18 {strides = array<i32>} : memref<1x1x128xf32, #tpu.memory_space<vmem>>, vector<1x1x128xf32>,
    return
  }
  func.func @transform_0(%arg0: i32) -> (i32, i32) {
    %c0_i32 = arith.constant 0 : i32
    %c0_i32_0 = arith.constant 0 : i32
    return %arg0, %c0_i32 : i32, i32
  }
  func.func @transform_1(%arg0: i32) -> (i32, i32) {
    %c0_i32 = arith.constant 0 : i32
    %c0_i32_0 = arith.constant 0 : i32
    return %arg0, %c0_i32 : i32, i32
  }
  func.func @transform_2(%arg0: i32) -> (i32, i32, i32) {
    %c0_i32 = arith.constant 0 : i32
    %c0_i32_0 = arith.constant 0 : i32
    %c0_i32_1 = arith.constant 0 : i32
    return %arg0, %c0_i32, %c0_i32_0 : i32, i32, i32
  }
}

</mosaic_0001>

<bundles_post_ra>
// kernel: tpu_custom_call.1
= control target key start
LH: loop header
LB: loop body
LE: loop exit
PB: predicated region body
PF: predicated region fallthrough
CT: control target
= control target key end

     0   :  { %s116_s0 = inlined_call_operand.vmem [shape: f32[8,128], index: 0, kind: input, shape index: {}]   ;;  %s117_s1 = inlined_call_operand.vmem [shape: s32[8,1], index: 1, kind: input, shape index: {}]   ;;  %s118_s2 = inlined_call_operand.hbm [shape: f32[1,1,128], index: 2, kind: output, shape index: {}]  }
   0x1   :  { %v13_v0 = vld [vmem:[%s117_s1] sm:$0xff] }
   0x2   :  { %7 = vsyncpa [#allocation3], 0  ;;  %v81_v1 = vmov 0   ;;  %v14_v2 = vlaneseq  ;;  %v12_v4 = vld [vmem:[%s116_s0] sm:$0xff]  ;;  %vm23_vm1 = vcmask 7168   ;;  %s82_s1 = smov [#allocation2]  }
   0x3   :  { %56 = vset.pattern.permute.xlu0 %v81_v1  ;;  %s44_s13 = sshll.u32 %s82_s1, 4  ;;  %s45_s13 = int_to_ptr.vmem [resolvable:$true] %s44_s13 }
   0x4   :  { %17 = vperm.xlu0 %56, %v13_v0   ;;  %v15_v3 = vand.u32 127, %v14_v2  ;;  %s57_s14 = scalar_lea.vmem %s45_s13, 16  ;;  %s61_s15 = scalar_lea.vmem %s45_s13, 32 }
   0x5   :  { %p58_p0 = scmp.ne.s32.totalorder %s45_s13, %s57_s14  ;;  %p62_p1 = scmp.lt.s32.totalorder %s45_s13, %s45_s13 }
   0x6   :  { %vm34_vm2 = vcmp.eq.s32.totalorder %v15_v3, 0  ;;  %p63_p2 = scmp.lt.s32.totalorder %s61_s15, %s57_s14 }
   0x8   :  { %p64_p3 = por %p63_p2, %p62_p1 }
   0xa   :  { %p65_p4 = pnand %p64_p3, %p58_p0 }
  0x83   :  { %v18_v5 = vpop.permute.xlu0 %17 }
  0x84   :  { %vm19_vm0 = vcmp.eq.s32.totalorder %v15_v3, %v18_v5 }
  0x85   :  { %v20_v6 = vsel %vm19_vm0, %v12_v4, 0.0 }
  0x86   :  { %21 = vadd.xlane.f32.xlu0 %v20_v6 }
 0x113   :  { %v22_v7 = vpop.xlane.xlu0 %21 }
 0x114   :  { %v24_v8 = vsel %vm23_vm1, %v22_v7, 0.0 }
 0x115   :  { %25 = vadd.xlane.f32.xlu1 %v24_v8 }
 0x1a2   :  { %v26_v9 = vpop.xlane.xlu1 %25 }
 0x1a3   :  { %v27_v10 = vrot.slane %v26_v9, 4 }
 0x1a5   :  { %v28_v11 = vadd.f32 %v27_v10, %v26_v9 }
 0x1a7   :  { %v29_v12 = vrot.slane %v28_v11, 2 }
 0x1a9   :  { %v30_v13 = vadd.f32 %v29_v12, %v28_v11 }
 0x1ab   :  { %v31_v14 = vrot.slane %v30_v13, 1 }
 0x1ad   :  { %v32_v15 = vadd.f32 %v31_v14, %v30_v13 }
 0x1af   :  { %52 = vpush %v32_v15 }
 0x1e0   :  { %s53_s0 = spop %52 }
 0x1e1   :  { %v35_v16 = vstv %s53_s0 }
 0x1e2   :  { %v36_v17 = vsel %vm34_vm2, %v35_v16, 0.0 }
 0x1e3   :  { %37 = vst [vmem:[#allocation2] sm:$0x1] %v36_v17 }
 0x1e4   :  { %68 = shalt.err (!%p65_p4)
}
 0x1e5   :  { %s69_s18 = scalar_lea.hbm %s118_s2, 16 }
 0x1e6   :  { %p70_p5 = scmp.ne.s32.totalorder %s118_s2, %s69_s18  ;;  %p73_p6 = scmp.lt.u32.totalorder %s69_s18, %s118_s2 }
 0x1e8   :  { %p75_p7 = pnand %p73_p6, %p70_p5 }
 0x1ea   :  { %78 = shalt.err (!%p75_p7)
}
 0x1eb   :  { %47 = dma.vmem_to_hbm [thread:$0]  %s45_s13, 16, %s118_s2, [#allocation3]  }
 0x1ec   :  { %79 = dma.done.wait [#allocation3], 16  }
 0x1ed   :  { %80 = vsyncadd [#allocation3], 4294967280 }
 0x1ee   :  { %51 = vsyncpa [#allocation3], 1 }

</bundles_post_ra>
